<compile_context>
chip_gen: v7x
topology: tpu7x:2x2x1
jax: 0.10.0
libtpu: 0.0.40
codegen_flags: <defaults>
</compile_context>

<pallas_src>
import functools

import jax
import jax.numpy as jnp
from jax.experimental import pallas as pl
from jax.experimental.pallas import tpu as pltpu

num_pontos_por_funcao = 50
INPUT_SIZE = num_pontos_por_funcao          # 50
OUTPUT_SIZE = num_pontos_por_funcao         # 50
HIDDEN_SIZES = [64, 32]                     # hidden_sizes chosen for this synthetic run

LANE = 128


def _round_up(n, m):
    return ((n + m - 1) // m) * m


def _pad2d(a, rows, cols):
    r, c = a.shape
    return jnp.pad(a, ((0, rows - r), (0, cols - c)))


def _choose_batch_tile(B, tile_b):
    """Pick a batch tile TB (multiple of 16) and padded batch Bp.

    Ensures at least 2 grid steps when the batch allows it so the 'parallel'
    batch axis can be sharded across both v7x TensorCores."""
    tile_b = max(16, _round_up(tile_b, 16))
    Bp16 = _round_up(max(B, 16), 16)
    half = _round_up((Bp16 + 1) // 2, 16)
    TB = min(tile_b, half) if Bp16 >= 32 else Bp16
    Bp = _round_up(Bp16, TB)
    return TB, Bp, Bp // TB


def mlp_kernel(x_ref, w1_ref, b1_ref, w2_ref, b2_ref, w3_ref, b3_ref, o_ref):
    # One batch tile per grid step. x arrives as raw f32 [TB, 50]; cast to bf16
    # on the VPU. Weights are resident bf16; matmuls accumulate in f32 on the
    # MXU (K=50 contraction is handled/masked by Mosaic); bias add + tanh in
    # f32; output stored lane-dense as bf16.
    x = x_ref[...].astype(jnp.bfloat16)                                 # [TB, K]
    h1 = jnp.tanh(
        jnp.dot(x, w1_ref[...], preferred_element_type=jnp.float32) + b1_ref[...]
    )
    h2 = jnp.tanh(
        jnp.dot(h1.astype(jnp.bfloat16), w2_ref[...],
                preferred_element_type=jnp.float32) + b2_ref[...]
    )
    out = jnp.dot(h2.astype(jnp.bfloat16), w3_ref[...],
                  preferred_element_type=jnp.float32) + b3_ref[...]
    o_ref[...] = out.astype(o_ref.dtype)                                # bf16


def prepare_params(params):
    """One-time (outside the hot path) lane padding + bf16 cast of the weights.

    params: list of (W[in, out], b[1, out]) float32 arrays.
    Padded bias/weight lanes are zero, so padded lanes stay exactly zero
    through tanh (tanh(0)=0) and are sliced off in the wrapper.
    Returns (prepared_tuple, out_features)."""
    (w1, b1), (w2, b2), (w3, b3) = params
    K, H1 = w1.shape
    H2 = w2.shape[1]
    O = w3.shape[1]
    H1p, H2p, Op = (_round_up(d, LANE) for d in (H1, H2, O))

    w1p = _pad2d(w1, K, H1p).astype(jnp.bfloat16)     # K stays un-padded (50)
    w2p = _pad2d(w2, H1p, H2p).astype(jnp.bfloat16)
    w3p = _pad2d(w3, H2p, Op).astype(jnp.bfloat16)
    b1p = _pad2d(b1, 1, H1p).astype(jnp.float32)
    b2p = _pad2d(b2, 1, H2p).astype(jnp.float32)
    b3p = _pad2d(b3, 1, Op).astype(jnp.float32)
    prepared = (w1p, b1p, w2p, b2p, w3p, b3p)
    return jax.tree_util.tree_map(jax.device_put, prepared), O


@functools.partial(jax.jit, static_argnames=("out_features", "tile_b"))
def mlp_derivadas_forward(x, prepared, *, out_features, tile_b=512):
    """x: [B, INPUT_SIZE] float32. prepared: output of prepare_params."""
    w1p, b1p, w2p, b2p, w3p, b3p = prepared
    B, K = x.shape
    H1p = w1p.shape[1]
    H2p = w2p.shape[1]
    Op = w3p.shape[1]

    TB, Bp, n_tiles = _choose_batch_tile(B, tile_b)
    if Bp != B:
        x = jnp.pad(x, ((0, Bp - B), (0, 0)))         # row padding only

    flops = 2 * Bp * (K * H1p + H1p * H2p + H2p * Op)
    bytes_accessed = (
        Bp * K * 4                                     # x (f32, streamed)
        + (w1p.size + w2p.size + w3p.size) * 2         # resident bf16 weights
        + (b1p.size + b2p.size + b3p.size) * 4         # resident f32 biases
        + Bp * Op * 2                                  # bf16 output
    )
    transcendentals = Bp * (H1p + H2p)

    # Per-step VMEM footprint estimate (x dbuf f32 lane-padded, out dbuf bf16,
    # f32 intermediates). Only force a higher scoped-VMEM limit when a very
    # large TB would blow v5e's 16 MiB default.
    vmem_est = (
        2 * TB * LANE * 4          # x double buffer
        + 2 * TB * LANE * 2        # out double buffer
        + 3 * TB * LANE * 4        # h1 / h2 / out f32 intermediates
        + (w1p.size + w2p.size + w3p.size) * 2
        + (b1p.size + b2p.size + b3p.size) * 4
    )
    cp_kwargs = dict(dimension_semantics=("parallel",))
    if vmem_est > 12 * 1024 * 1024:
        cp_kwargs["vmem_limit_bytes"] = min(2 * vmem_est, 64 * 1024 * 1024)

    out_padded = pl.pallas_call(
        mlp_kernel,
        out_shape=jax.ShapeDtypeStruct((Bp, Op), jnp.bfloat16),
        grid=(n_tiles,),
        in_specs=[
            pl.BlockSpec((TB, K), lambda i: (i, 0)),        # x tile (pipelined)
            pl.BlockSpec((K, H1p), lambda i: (0, 0)),       # W1 resident
            pl.BlockSpec((1, H1p), lambda i: (0, 0)),       # b1 resident
            pl.BlockSpec((H1p, H2p), lambda i: (0, 0)),     # W2 resident
            pl.BlockSpec((1, H2p), lambda i: (0, 0)),       # b2 resident
            pl.BlockSpec((H2p, Op), lambda i: (0, 0)),      # W3 resident
            pl.BlockSpec((1, Op), lambda i: (0, 0)),        # b3 resident
        ],
        out_specs=pl.BlockSpec((TB, Op), lambda i: (i, 0)),
        compiler_params=pltpu.CompilerParams(**cp_kwargs),
        cost_estimate=pl.CostEstimate(
            flops=flops,
            bytes_accessed=bytes_accessed,
            transcendentals=transcendentals,
        ),
    )(x, w1p, b1p, w2p, b2p, w3p, b3p)

    # Drop batch padding + padded output lanes; upcast once (module is f32).
    return out_padded[:B, :out_features].astype(jnp.float32)


def init_params(key, input_size, hidden_sizes, output_size):
    """Deterministic init mimicking nn.Linear default: U(-1/sqrt(fan_in), 1/sqrt(fan_in)).
    Weights stored as [in, out] (transposed vs. PyTorch's [out, in])."""
    sizes = [input_size] + list(hidden_sizes) + [output_size]
    params = []
    for i in range(len(sizes) - 1):
        fan_in, fan_out = sizes[i], sizes[i + 1]
        key, kw, kb = jax.random.split(key, 3)
        bound = 1.0 / jnp.sqrt(float(fan_in))
        w = jax.random.uniform(kw, (fan_in, fan_out), jnp.float32, -bound, bound)
        b = jax.random.uniform(kb, (1, fan_out), jnp.float32, -bound, bound)
        params.append((w, b))
    return params


def reference_forward_f32(x, params):
    h = x
    for w, b in params[:-1]:
        h = jnp.tanh(h @ w + b)
    w, b = params[-1]
    return h @ w + b


def reference_forward_bf16path(x, params):
    """Same precision path as the kernel: bf16 matmul operands, f32 accumulation,
    f32 bias add + tanh, final output rounded to bf16."""
    h = x.astype(jnp.bfloat16)
    for w, b in params[:-1]:
        a = jnp.dot(h, w.astype(jnp.bfloat16),
                    preferred_element_type=jnp.float32) + b
        h = jnp.tanh(a).astype(jnp.bfloat16)
    w, b = params[-1]
    out = jnp.dot(h, w.astype(jnp.bfloat16),
                  preferred_element_type=jnp.float32) + b
    return out.astype(jnp.bfloat16).astype(jnp.float32)


if __name__ == "__main__":
    key = jax.random.PRNGKey(0)
    key, kx1, kx2 = jax.random.split(key, 3)

    params = init_params(key, INPUT_SIZE, HIDDEN_SIZES, OUTPUT_SIZE)
    prepared, out_features = prepare_params(params)

    # Case 1: batch=256 -> TB=128, 2 grid steps (exercises the pipelined grid
    # and v7x 2-TC sharding).
    batch = 256
    x = jax.random.normal(kx1, (batch, INPUT_SIZE), jnp.float32)
    out = mlp_derivadas_forward(x, prepared, out_features=out_features)
    jax.block_until_ready(out)
    assert out.shape == (batch, OUTPUT_SIZE)

    ref_bf16 = reference_forward_bf16path(x, params)
    assert jnp.allclose(out, ref_bf16, atol=1e-2, rtol=1e-2), "mismatch vs bf16-path reference"
    ref_f32 = reference_forward_f32(x, params)
    assert jnp.allclose(out, ref_f32, atol=1e-1, rtol=1e-1), "mismatch vs f32 reference"

    # Case 2: odd batch=40 -> exercises row padding (Bp=64, TB=32, 2 steps).
    batch2 = 40
    x2 = jax.random.normal(kx2, (batch2, INPUT_SIZE), jnp.float32)
    out2 = mlp_derivadas_forward(x2, prepared, out_features=out_features)
    jax.block_until_ready(out2)
    assert out2.shape == (batch2, OUTPUT_SIZE)
    assert jnp.allclose(out2, reference_forward_bf16path(x2, params),
                        atol=1e-2, rtol=1e-2), "mismatch vs bf16-path reference (padded batch)"

    print("KERNEL_OK")
</pallas_src>

<mosaic_0001>
module attributes {stable_mosaic.version = 11 : i64} {
  func.func @mlp_kernel(%arg0: i32, %arg1: memref<128x50xf32, #tpu.memory_space<vmem>>, %arg2: memref<50x128xbf16, #tpu.memory_space<vmem>>, %arg3: memref<1x128xf32, #tpu.memory_space<vmem>>, %arg4: memref<128x128xbf16, #tpu.memory_space<vmem>>, %arg5: memref<1x128xf32, #tpu.memory_space<vmem>>, %arg6: memref<128x128xbf16, #tpu.memory_space<vmem>>, %arg7: memref<1x128xf32, #tpu.memory_space<vmem>>, %arg8: memref<128x128xbf16, #tpu.memory_space<vmem>>) attributes {dimension_semantics = [#tpu.dimension_semantics<parallel>], iteration_bounds = array<i64: 2>, scalar_prefetch = 0 : i64, scratch_operands = 0 : i64, tpu.core_type = #tpu.core_type<tc>, window_params = [{transform_indices = @transform_0, window_bounds = array<i64: 128, 50>}, {pipeline_mode = #tpu.pipeline_mode<synchronous>, transform_indices = @transform_1, window_bounds = array<i64: 50, 128>}, {pipeline_mode = #tpu.pipeline_mode<synchronous>, transform_indices = @transform_2, window_bounds = array<i64: 1, 128>}, {pipeline_mode = #tpu.pipeline_mode<synchronous>, transform_indices = @transform_3, window_bounds = array<i64: 128, 128>}, {pipeline_mode = #tpu.pipeline_mode<synchronous>, transform_indices = @transform_4, window_bounds = array<i64: 1, 128>}, {pipeline_mode = #tpu.pipeline_mode<synchronous>, transform_indices = @transform_5, window_bounds = array<i64: 128, 128>}, {pipeline_mode = #tpu.pipeline_mode<synchronous>, transform_indices = @transform_6, window_bounds = array<i64: 1, 128>}, {transform_indices = @transform_7, window_bounds = array<i64: 128, 128>}]} {
    %c0 = arith.constant 0 : index
    %c0_0 = arith.constant 0 : index
    %0 = vector.load %arg1[%c0, %c0_0] : memref<128x50xf32, #tpu.memory_space<vmem>>, vector<128x50xf32>
    %1 = arith.truncf %0 : vector<128x50xf32> to vector<128x50xbf16>
    %c0_1 = arith.constant 0 : index
    %c0_2 = arith.constant 0 : index
    %2 = vector.load %arg2[%c0_1, %c0_2] : memref<50x128xbf16, #tpu.memory_space<vmem>>, vector<50x128xbf16>
    %cst = arith.constant dense<0.000000e+00> : vector<128x128xf32>
    %3 = tpu.matmul %1, %2, %cst {dimension_numbers = #tpu.dot_dimension_numbers<[1], [0], [0], [1], [0, 0, 1, 1], [], []>} : vector<128x50xbf16>, vector<50x128xbf16>, vector<128x128xf32> -> vector<128x128xf32>
    %c0_3 = arith.constant 0 : index
    %c0_4 = arith.constant 0 : index
    %4 = vector.load %arg3[%c0_3, %c0_4] : memref<1x128xf32, #tpu.memory_space<vmem>>, vector<1x128xf32>
    %5 = vector.broadcast %4 : vector<1x128xf32> to vector<128x128xf32>
    %6 = arith.addf %3, %5 : vector<128x128xf32>
    %7 = math.tanh %6 : vector<128x128xf32>
    %8 = arith.truncf %7 : vector<128x128xf32> to vector<128x128xbf16>
    %c0_5 = arith.constant 0 : index
    %c0_6 = arith.constant 0 : index
    %9 = vector.load %arg4[%c0_5, %c0_6] : memref<128x128xbf16, #tpu.memory_space<vmem>>, vector<128x128xbf16>
    %cst_7 = arith.constant dense<0.000000e+00> : vector<128x128xf32>
    %10 = tpu.matmul %8, %9, %cst_7 {dimension_numbers = #tpu.dot_dimension_numbers<[1], [0], [0], [1], [0, 0, 1, 1], [], []>} : vector<128x128xbf16>, vector<128x128xbf16>, vector<128x128xf32> -> vector<128x128xf32>
    %c0_8 = arith.constant 0 : index
    %c0_9 = arith.constant 0 : index
    %11 = vector.load %arg5[%c0_8, %c0_9] : memref<1x128xf32, #tpu.memory_space<vmem>>, vector<1x128xf32>
    %12 = vector.broadcast %11 : vector<1x128xf32> to vector<128x128xf32>
    %13 = arith.addf %10, %12 : vector<128x128xf32>
    %14 = math.tanh %13 : vector<128x128xf32>
    %15 = arith.truncf %14 : vector<128x128xf32> to vector<128x128xbf16>
    %c0_10 = arith.constant 0 : index
    %c0_11 = arith.constant 0 : index
    %16 = vector.load %arg6[%c0_10, %c0_11] : memref<128x128xbf16, #tpu.memory_space<vmem>>, vector<128x128xbf16>
    %cst_12 = arith.constant dense<0.000000e+00> : vector<128x128xf32>
    %17 = tpu.matmul %15, %16, %cst_12 {dimension_numbers = #tpu.dot_dimension_numbers<[1], [0], [0], [1], [0, 0, 1, 1], [], []>} : vector<128x128xbf16>, vector<128x128xbf16>, vector<128x128xf32> -> vector<128x128xf32>
    %c0_13 = arith.constant 0 : index
    %c0_14 = arith.constant 0 : index
    %18 = vector.load %arg7[%c0_13, %c0_14] : memref<1x128xf32, #tpu.memory_space<vmem>>, vector<1x128xf32>
    %19 = vector.broadcast %18 : vector<1x128xf32> to vector<128x128xf32>
    %20 = arith.addf %17, %19 : vector<128x128xf32>
    %21 = arith.truncf %20 : vector<128x128xf32> to vector<128x128xbf16>
    %c0_15 = arith.constant 0 : index
    %c0_16 = arith.constant 0 : index
    %22 = vector.load %arg8[%c0_15, %c0_16] : memref<128x128xbf16, #tpu.memory_space<vmem>>, vector<128x128xbf16>
    tpu.vector_store %arg8[%c0_15, %c0_16], %21 {strides = array<i32>} : memref<128x128xbf16, #tpu.memory_space<vmem>>, vector<128x128xbf16>,
    return
  }
  func.func @transform_0(%arg0: i32) -> (i32, i32) {
    %c0_i32 = arith.constant 0 : i32
    %c0_i32_0 = arith.constant 0 : i32
    return %arg0, %c0_i32 : i32, i32
  }
  func.func @transform_1(%arg0: i32) -> (i32, i32) {
    %c0_i32 = arith.constant 0 : i32
    %c0_i32_0 = arith.constant 0 : i32
    %c0_i32_1 = arith.constant 0 : i32
    return %c0_i32, %c0_i32_0 : i32, i32
  }
  func.func @transform_2(%arg0: i32) -> (i32, i32) {
    %c0_i32 = arith.constant 0 : i32
    %c0_i32_0 = arith.constant 0 : i32
    %c0_i32_1 = arith.constant 0 : i32
    return %c0_i32, %c0_i32_0 : i32, i32
  }
  func.func @transform_3(%arg0: i32) -> (i32, i32) {
    %c0_i32 = arith.constant 0 : i32
    %c0_i32_0 = arith.constant 0 : i32
    %c0_i32_1 = arith.constant 0 : i32
    return %c0_i32, %c0_i32_0 : i32, i32
  }
  func.func @transform_4(%arg0: i32) -> (i32, i32) {
    %c0_i32 = arith.constant 0 : i32
    %c0_i32_0 = arith.constant 0 : i32
    %c0_i32_1 = arith.constant 0 : i32
    return %c0_i32, %c0_i32_0 : i32, i32
  }
  func.func @transform_5(%arg0: i32) -> (i32, i32) {
    %c0_i32 = arith.constant 0 : i32
    %c0_i32_0 = arith.constant 0 : i32
    %c0_i32_1 = arith.constant 0 : i32
    return %c0_i32, %c0_i32_0 : i32, i32
  }
  func.func @transform_6(%arg0: i32) -> (i32, i32) {
    %c0_i32 = arith.constant 0 : i32
    %c0_i32_0 = arith.constant 0 : i32
    %c0_i32_1 = arith.constant 0 : i32
    return %c0_i32, %c0_i32_0 : i32, i32
  }
  func.func @transform_7(%arg0: i32) -> (i32, i32) {
    %c0_i32 = arith.constant 0 : i32
    %c0_i32_0 = arith.constant 0 : i32
    return %arg0, %c0_i32 : i32, i32
  }
}

</mosaic_0001>

<bundles_post_ra>
// kernel: mlp_derivadas_forward.1
= control target key start
LH: loop header
LB: loop body
LE: loop exit
PB: predicated region body
PF: predicated region fallthrough
CT: control target
= control target key end

     0   :  { %s1398_s24 = smov 0   ;;  %s1554_s0 = inlined_call_operand.vmem [shape: f32[256,50], index: 0, kind: input, shape index: {}]   ;;  %s1555_s1 = inlined_call_operand.vmem [shape: bf16[50,128], index: 1, kind: input, shape index: {}]   ;;  %s1556_s2 = inlined_call_operand.vmem [shape: f32[1,128], index: 2, kind: input, shape index: {}]   ;;  %s1557_s3 = inlined_call_operand.vmem [shape: bf16[128,128], index: 3, kind: input, shape index: {}]   ;;  %s1558_s4 = inlined_call_operand.vmem [shape: f32[1,128], index: 4, kind: input, shape index: {}]   ;;  %s1559_s5 = inlined_call_operand.vmem [shape: bf16[128,128], index: 5, kind: input, shape index: {}]   ;;  %s1560_s6 = inlined_call_operand.vmem [shape: f32[1,128], index: 6, kind: input, shape index: {}]   ;;  %s1561_s7 = inlined_call_operand.vmem [shape: bf16[256,128], index: 7, kind: output, shape index: {}]  }
   0x1 LB: > { %s988_s25 = sadd.s32 4294967295, %s1356_s24   ;;  %p992_p0 = scmp.ge.s32.totalorder %s1356_s24, 1  ;;  %s1356_s24 = sphi %s1398_s24, %s17_s24  }
   0x2   : > { %p238_p1 = scmp.lt.s32.totalorder %s1356_s24, 3 }
   0x4   : > { %p239_p2 = pnand %p992_p0, %p238_p1 }
   0x5   : > { %v1266_v0 = vld [vmem:[%s1555_s1] sm:$0xff] (!%p239_p2)   ;;  %v1267_v1 = vld [vmem:[%s1555_s1 + $0x8] sm:$0xff] (!%p239_p2)   ;;  %s993_s30 = sshll.u32 (!%p239_p2), %s988_s25, 4  ;;  %v1268_v2 = vld [vmem:[%s1555_s1 + $0x10] sm:$0xff] (!%p239_p2)   ;;  %vm342_vm0 = vcmask (!%p239_p2), 408576   ;;  %vm367_vm1 = vcmask (!%p239_p2), 1040384  }
   0x6   : > { %242 = sbr.rel (%p239_p2) target bundleno = 728 (0x2d8), region = 48  ;;  %1153 = vmatprep.subr.bf16.mxu0 (!%p239_p2), %v1266_v0  ;;  %p271_p3 = scmp.lt.s32.totalorder (!%p239_p2), %s993_s30, 31  ;;  %v1270_v3 = vld [vmem:[%s1557_s3] sm:$0xff] (!%p239_p2)   ;;  %v1271_v4 = vld [vmem:[%s1557_s3 + $0x8] sm:$0xff] (!%p239_p2)   ;;  %v1272_v9 = vld [vmem:[%s1557_s3 + $0x10] sm:$0xff] (!%p239_p2)  }
   0x7   : > { %1154 = vmatpush3.bf16.msra.mxu0 (!%p239_p2), %v1266_v0  ;;  %1177 = vmatprep.subr.bf16.mxu1 (!%p239_p2), %v1270_v3  ;;  %v1269_v5 = vld [vmem:[%s1555_s1 + $0x18] ss:$0 sps:$4 sm:$0x11] (!%p239_p2)   ;;  %v1274_v33 = vld [vmem:[%s1557_s3 + $0x20] sm:$0xff] (!%p239_p2)   ;;  %v1275_v34 = vld [vmem:[%s1557_s3 + $0x28] sm:$0xff] (!%p239_p2)  }
   0x8   : > { %1155 = vmatprep.subr.bf16.mxu0 (!%p239_p2), %v1267_v1  ;;  %1178 = vmatpush3.bf16.msra.mxu1 (!%p239_p2), %v1270_v3  ;;  %v369_v12 = vsel (!%p239_p2), %vm367_vm1, %v1269_v5, 0  ;;  %v1273_v32 = vld [vmem:[%s1557_s3 + $0x18] sm:$0xff] (!%p239_p2)   ;;  %v1276_v35 = vld [vmem:[%s1557_s3 + $0x30] sm:$0xff] (!%p239_p2)   ;;  %v1278_v37 = vld [vmem:[%s1559_s5] sm:$0xff] (!%p239_p2)  }
   0x9   : > { %1179 = vmatprep.subr.bf16.mxu1 (!%p239_p2), %v1271_v4  ;;  %v1277_v36 = vld [vmem:[%s1557_s3 + $0x38] sm:$0xff] (!%p239_p2)   ;;  %v1480_v38 = vld [vmem:[%s1559_s5 + $0x8] sm:$0xff] (!%p239_p2)   ;;  %v1486_v39 = vld [vmem:[%s1559_s5 + $0x10] sm:$0xff] (!%p239_p2)  }
   0xa   : > { %v1494_v40 = vld [vmem:[%s1556_s2] ss:$0 sm:$0xff] (!%p239_p2) }
   0xb   : > { %1156 = vmatpush3.bf16.msra.mxu0 (!%p239_p2), %v1267_v1 }
   0xc   : > { %1157 = vmatprep.subr.bf16.mxu0 (!%p239_p2), %v1268_v2  ;;  %1180 = vmatpush3.bf16.msra.mxu1 (!%p239_p2), %v1271_v4 }
   0xd   : > { %s1563_s30 = smov (!%p271_p3, %s993_s30), 31  ;;  %1181 = vmatprep.subr.bf16.mxu1 %v1272_v9 }
   0xe   : > { %s994_s14 = sshll.u32 %s1563_s30, 3  ;;  %s996_s12 = sshll.u32 %s1563_s30, 2 }
   0xf   : > { %s1427_s17 = scalar_lea.vmem %s1554_s0, %s994_s14  ;;  %1158 = vmatpush3.bf16.msra.mxu0 %v1268_v2  ;;  %s1541_s15 = scalar_lea.vmem %s1561_s7, %s996_s12 }
  0x10   : > { %v283_v6 = vld [vmem:[%s1427_s17] sm:$0xff]  ;;  %v284_v7 = vld [vmem:[%s1427_s17 + $0x8] sm:$0xff]  ;;  %v285_v10 = vld [vmem:[%s1427_s17 + $0x10] sm:$0xff]  ;;  %1257 = vmatprep.subr.msk.bf16.mxu0 %vm367_vm1, %v1269_v5  ;;  %1182 = vmatpush3.bf16.msra.mxu1 %v1272_v9 }
  0x11   : > { %v299_v8 = vpack.c.bf16 %v284_v7, %v283_v6  ;;  %v286_v11 = vld [vmem:[%s1427_s17 + $0x18] sm:$0xff]  ;;  %v287_v13 = vld [vmem:[%s1427_s17 + $0x20] sm:$0xff]  ;;  %v288_v14 = vld [vmem:[%s1427_s17 + $0x28] sm:$0xff]  ;;  %1183 = vmatprep.subr.bf16.mxu1 %v1273_v32 }
  0x12   : > { %v300_v15 = vpack.c.bf16 %v286_v11, %v285_v10  ;;  %v301_v16 = vpack.c.bf16 %v288_v14, %v287_v13  ;;  %v289_v17 = vld [vmem:[%s1427_s17 + $0x30] sm:$0xff]  ;;  %v290_v18 = vld [vmem:[%s1427_s17 + $0x38] sm:$0xff]  ;;  %v291_v19 = vld [vmem:[%s1427_s17 + $0x40] sm:$0xff] }
  0x13   : > { %1161 = vmatprep.mubr.msk.bf16.mxu0 %vm342_vm0, %v299_v8  ;;  %1160 = vmatpush3.bf16.msra.mxu0 %v369_v12  ;;  %v292_v20 = vld [vmem:[%s1427_s17 + $0x48] sm:$0xff]  ;;  %v302_v21 = vpack.c.bf16 %v290_v18, %v289_v17  ;;  %v293_v23 = vld [vmem:[%s1427_s17 + $0x50] sm:$0xff]  ;;  %v294_v24 = vld [vmem:[%s1427_s17 + $0x58] sm:$0xff] }
  0x14   : > { %v303_v22 = vpack.c.bf16 %v292_v20, %v291_v19  ;;  %v295_v25 = vld [vmem:[%s1427_s17 + $0x60] sm:$0xff]  ;;  %v296_v26 = vld [vmem:[%s1427_s17 + $0x68] sm:$0xff]  ;;  %v304_v27 = vpack.c.bf16 %v294_v24, %v293_v23  ;;  %v297_v29 = vld [vmem:[%s1427_s17 + $0x70] sm:$0xff]  ;;  %1184 = vmatpush3.bf16.msra.mxu1 %v1273_v32  ;;  %1209 = vmatprep.subr.bf16.mxu0 %v1278_v37 }
  0x15   : > { %v305_v28 = vpack.c.bf16 %v296_v26, %v295_v25  ;;  %v298_v30 = vld [vmem:[%s1427_s17 + $0x78] sm:$0xff]  ;;  %1185 = vmatprep.subr.bf16.mxu1 %v1274_v33 }
  0x16   : > { %1162 = vmatmul.mubr.msk.bf16.vlgmr.msra.gmra.mrb[0].mxu0 %vm342_vm0, %v300_v15  ;;  %v306_v31 = vpack.c.bf16 %v298_v30, %v297_v29 }
  0x17   : > { %1165 = vmatprep.mubr.msk.bf16.mxu0 %vm342_vm0, %v301_v16  ;;  %1210 = vmatpush3.bf16.msra.mxu0 %v1278_v37 }
  0x18   : > { %1186 = vmatpush3.bf16.msra.mxu1 %v1274_v33  ;;  %1211 = vmatprep.subr.bf16.mxu0 %v1480_v38  ;;  %v1281_v33 = vld [vmem:[%s1559_s5 + $0x18] sm:$0xff]  }
  0x19   : > { %1187 = vmatprep.subr.bf16.mxu1 %v1275_v34 }
  0x1b   : > { %1212 = vmatpush3.bf16.msra.mxu0 %v1480_v38 }
  0x1c   : > { %1188 = vmatpush3.bf16.msra.mxu1 %v1275_v34  ;;  %1213 = vmatprep.subr.bf16.mxu0 %v1486_v39  ;;  %v1282_v34 = vld [vmem:[%s1559_s5 + $0x20] sm:$0xff]  }
  0x1d   : > { %1189 = vmatprep.subr.bf16.mxu1 %v1276_v35 }
  0x1e   : > { %1166 = vmatmul.mubr.msk.bf16.gmra.mrb[4].mxu0 %vm342_vm0, %v302_v21 }
  0x1f   : > { %1169 = vmatprep.mubr.msk.bf16.mxu0 %vm342_vm0, %v303_v22  ;;  %1214 = vmatpush3.bf16.msra.mxu0 %v1486_v39 }
  0x20   : > { %1190 = vmatpush3.bf16.msra.mxu1 %v1276_v35  ;;  %1215 = vmatprep.subr.bf16.mxu0 %v1281_v33  ;;  %v1283_v35 = vld [vmem:[%s1559_s5 + $0x28] sm:$0xff]  }
  0x21   : > { %1191 = vmatprep.subr.bf16.mxu1 %v1277_v36 }
  0x23   : > { %1216 = vmatpush3.bf16.msra.mxu0 %v1281_v33 }
  0x24   : > { %1192 = vmatpush3.bf16.msra.mxu1 %v1277_v36  ;;  %1217 = vmatprep.subr.bf16.mxu0 %v1282_v34  ;;  %v1284_v36 = vld [vmem:[%s1559_s5 + $0x30] sm:$0xff]  }
  0x25   : > { %1241 = vmatprep.subr.bf16.mxu1 %v1278_v37 }
  0x26   : > { %1170 = vmatmul.mubr.msk.bf16.gmra.mrb[8].mxu0 %vm342_vm0, %v304_v27 }
  0x27   : > { %1173 = vmatprep.mubr.msk.bf16.mxu0 %vm342_vm0, %v305_v28  ;;  %1218 = vmatpush3.bf16.msra.mxu0 %v1282_v34 }
  0x28   : > { %1219 = vmatprep.subr.bf16.mxu0 %v1283_v35 }
  0x2b   : > { %1220 = vmatpush3.bf16.msra.mxu0 %v1283_v35 }
  0x2c   : > { %1221 = vmatprep.subr.bf16.mxu0 %v1284_v36 }
  0x2e   : > { %1174 = vmatmul.mubr.msk.bf16.gmra.mrb[12].mxu0 %vm342_vm0, %v306_v31 }
  0x2f   : > { %1222 = vmatpush3.bf16.msra.mxu0 %v1284_v36 }
  0xe9   : > { %v1163_v41 = vpop.f32.mrb[0].mxu0 }
  0xea   : > { %v414_v42 = vadd.f32 %v1163_v41, %v1494_v40  ;;  %v405_v43 = vpop.f32.mrb[1].mxu0 }
  0xeb   : > { %v406_v44 = vadd.f32 %v1494_v40, %v405_v43  ;;  %v1164_v45 = vpop.f32.mrb[2].mxu0 }
  0xec   : > { %1286 = vtanh.f32 %v414_v42  ;;  %v417_v46 = vadd.f32 %v1164_v45, %v1494_v40  ;;  %v408_v47 = vpop.f32.mrb[3].mxu0 }
  0xed   : > { %1288 = vtanh.f32 %v406_v44  ;;  %v409_v48 = vadd.f32 %v1494_v40, %v408_v47 }
  0xee   : > { %1290 = vtanh.f32 %v417_v46 }
  0xef   : > { %1292 = vtanh.f32 %v409_v48 }
  0xf1   : > { %v1167_v49 = vpop.f32.mrb[4].mxu0 }
  0xf2   : > { %v430_v50 = vadd.f32 %v1167_v49, %v1494_v40  ;;  %v421_v51 = vpop.f32.mrb[5].mxu0 }
  0xf3   : > { %v422_v52 = vadd.f32 %v1494_v40, %v421_v51  ;;  %v1168_v53 = vpop.f32.mrb[6].mxu0 }
  0xf4   : > { %1294 = vtanh.f32 %v430_v50  ;;  %v433_v54 = vadd.f32 %v1168_v53, %v1494_v40  ;;  %v424_v55 = vpop.f32.mrb[7].mxu0 }
  0xf5   : > { %1296 = vtanh.f32 %v422_v52  ;;  %v425_v56 = vadd.f32 %v1494_v40, %v424_v55 }
  0xf6   : > { %v1287_v57 = vpop.eup %1286  ;;  %1298 = vtanh.f32 %v433_v54 }
  0xf7   : > { %v1289_v58 = vpop.eup %1288  ;;  %1300 = vtanh.f32 %v425_v56 }
  0xf8   : > { %v1291_v59 = vpop.eup %1290 }
  0xf9   : > { %v1293_v60 = vpop.eup %1292  ;;  %v1171_v61 = vpop.f32.mrb[8].mxu0  ;;  %v485_v62 = vpack.c.bf16 %v1291_v59, %v1287_v57 }
  0xfa   : > { %v446_v63 = vadd.f32 %v1171_v61, %v1494_v40  ;;  %v437_v0 = vpop.f32.mrb[9].mxu0  ;;  %v484_v1 = vpack.c.bf16 %v1293_v60, %v1289_v58 }
  0xfb   : > { %v438_v2 = vadd.f32 %v1494_v40, %v437_v0  ;;  %v1172_v3 = vpop.f32.mrb[10].mxu0 }
  0xfc   : > { %1302 = vtanh.f32 %v446_v63  ;;  %v449_v4 = vadd.f32 %v1172_v3, %v1494_v40  ;;  %v440_v5 = vpop.f32.mrb[11].mxu0  ;;  %1193 = vmatprep.mubr.bf16.mxu1 %v484_v1 }
  0xfd   : > { %1304 = vtanh.f32 %v438_v2  ;;  %v441_v6 = vadd.f32 %v1494_v40, %v440_v5  ;;  %1194 = vmatmul.mubr.bf16.vlgmr.msra.gmra.mrb[0].mxu1 %v485_v62 }
  0xfe   : > { %v1295_v7 = vpop.eup %1294  ;;  %1306 = vtanh.f32 %v449_v4  ;;  %1249 = vmatpush3.bf16.msra.mxu1 %v1278_v37  ;;  %v1285_v37 = vld [vmem:[%s1559_s5 + $0x38] sm:$0xff]  }
  0xff   : > { %v1297_v8 = vpop.eup %1296  ;;  %1308 = vtanh.f32 %v441_v6  ;;  %1242 = vmatprep.subr.bf16.mxu1 %v1480_v38  ;;  %1223 = vmatprep.subr.bf16.mxu0 %v1285_v37 }
 0x100   : > { %v1299_v9 = vpop.eup %1298  ;;  %1224 = vmatpush3.bf16.msra.mxu0 %v1285_v37 }
 0x101   : > { %v1301_v10 = vpop.eup %1300  ;;  %v1175_v11 = vpop.f32.mrb[12].mxu0  ;;  %v487_v12 = vpack.c.bf16 %v1299_v9, %v1295_v7 }
 0x102   : > { %v462_v13 = vadd.f32 %v1175_v11, %v1494_v40  ;;  %v453_v14 = vpop.f32.mrb[13].mxu0  ;;  %v486_v15 = vpack.c.bf16 %v1301_v10, %v1297_v8  ;;  %1250 = vmatpush3.bf16.msra.mxu1 %v1480_v38  ;;  %v1010_v38 = vld [vmem:[%s1558_s4] ss:$0 sm:$0xff] }
 0x103   : > { %v454_v16 = vadd.f32 %v1494_v40, %v453_v14  ;;  %v1176_v17 = vpop.f32.mrb[14].mxu0  ;;  %1243 = vmatprep.subr.bf16.mxu1 %v1486_v39 }
 0x104   : > { %1310 = vtanh.f32 %v462_v13  ;;  %v465_v18 = vadd.f32 %v1176_v17, %v1494_v40  ;;  %v456_v19 = vpop.f32.mrb[15].mxu0  ;;  %1197 = vmatprep.mubr.bf16.mxu1 %v486_v15 }
 0x105   : > { %1312 = vtanh.f32 %v454_v16  ;;  %v457_v20 = vadd.f32 %v1494_v40, %v456_v19  ;;  %1198 = vmatmul.mubr.bf16.gmra.mrb[4].mxu1 %v487_v12 }
 0x106   : > { %v1303_v21 = vpop.eup %1302  ;;  %1314 = vtanh.f32 %v465_v18  ;;  %1251 = vmatpush3.bf16.msra.mxu1 %v1486_v39 }
 0x107   : > { %v1305_v22 = vpop.eup %1304  ;;  %1316 = vtanh.f32 %v457_v20  ;;  %1244 = vmatprep.subr.bf16.mxu1 %v1281_v33 }
 0x108   : > { %v1307_v23 = vpop.eup %1306 }
 0x109   : > { %v1309_v24 = vpop.eup %1308  ;;  %v489_v25 = vpack.c.bf16 %v1307_v23, %v1303_v21 }
 0x10a   : > { %v488_v26 = vpack.c.bf16 %v1309_v24, %v1305_v22  ;;  %1252 = vmatpush3.bf16.msra.mxu1 %v1281_v33 }
 0x10b   : > { %1245 = vmatprep.subr.bf16.mxu1 %v1282_v34 }
 0x10c   : > { %1201 = vmatprep.mubr.bf16.mxu1 %v488_v26 }
 0x10d   : > { %1202 = vmatmul.mubr.bf16.gmra.mrb[8].mxu1 %v489_v25 }
 0x10e   : > { %v1311_v27 = vpop.eup %1310  ;;  %1253 = vmatpush3.bf16.msra.mxu1 %v1282_v34 }
 0x10f   : > { %v1313_v28 = vpop.eup %1312  ;;  %1246 = vmatprep.subr.bf16.mxu1 %v1283_v35 }
 0x110   : > { %v1315_v29 = vpop.eup %1314 }
 0x111   : > { %v1317_v30 = vpop.eup %1316  ;;  %v491_v31 = vpack.c.bf16 %v1315_v29, %v1311_v27 }
 0x112   : > { %v490_v32 = vpack.c.bf16 %v1317_v30, %v1313_v28  ;;  %1254 = vmatpush3.bf16.msra.mxu1 %v1283_v35 }
 0x113   : > { %1247 = vmatprep.subr.bf16.mxu1 %v1284_v36 }
 0x114   : > { %1205 = vmatprep.mubr.bf16.mxu1 %v490_v32  ;;  %v1019_v32 = vld [vmem:[%s1560_s6] ss:$0 sm:$0xff] }
 0x115   : > { %1206 = vmatmul.mubr.bf16.gmra.mrb[12].mxu1 %v491_v31 }
 0x116   : > { %1255 = vmatpush3.bf16.msra.mxu1 %v1284_v36 }
 0x117   : > { %1248 = vmatprep.subr.bf16.mxu1 %v1285_v37 }
 0x11a   : > { %1256 = vmatpush3.bf16.msra.mxu1 %v1285_v37 }
 0x1d0   : > { %v1195_v39 = vpop.f32.mrb[0].mxu1 }
 0x1d1   : > { %v606_v40 = vadd.f32 %v1195_v39, %v1010_v38  ;;  %v597_v41 = vpop.f32.mrb[1].mxu1 }
 0x1d2   : > { %v598_v42 = vadd.f32 %v1010_v38, %v597_v41  ;;  %v1196_v43 = vpop.f32.mrb[2].mxu1 }
 0x1d3   : > { %1318 = vtanh.f32 %v606_v40  ;;  %v609_v44 = vadd.f32 %v1196_v43, %v1010_v38  ;;  %v600_v45 = vpop.f32.mrb[3].mxu1 }
 0x1d4   : > { %1320 = vtanh.f32 %v598_v42  ;;  %v601_v46 = vadd.f32 %v1010_v38, %v600_v45 }
 0x1d5   : > { %1322 = vtanh.f32 %v609_v44 }
 0x1d6   : > { %1324 = vtanh.f32 %v601_v46 }
 0x1d8   : > { %v1199_v47 = vpop.f32.mrb[4].mxu1 }
 0x1d9   : > { %v622_v48 = vadd.f32 %v1199_v47, %v1010_v38  ;;  %v613_v49 = vpop.f32.mrb[5].mxu1 }
 0x1da   : > { %v614_v50 = vadd.f32 %v1010_v38, %v613_v49  ;;  %v1200_v51 = vpop.f32.mrb[6].mxu1 }
 0x1db   : > { %1326 = vtanh.f32 %v622_v48  ;;  %v625_v52 = vadd.f32 %v1200_v51, %v1010_v38  ;;  %v616_v53 = vpop.f32.mrb[7].mxu1 }
 0x1dc   : > { %1328 = vtanh.f32 %v614_v50  ;;  %v617_v54 = vadd.f32 %v1010_v38, %v616_v53 }
 0x1dd   : > { %v1319_v55 = vpop.eup %1318  ;;  %1330 = vtanh.f32 %v625_v52 }
 0x1de   : > { %v1321_v56 = vpop.eup %1320  ;;  %1332 = vtanh.f32 %v617_v54 }
 0x1df   : > { %v1323_v57 = vpop.eup %1322 }
 0x1e0   : > { %v1325_v58 = vpop.eup %1324  ;;  %v1203_v59 = vpop.f32.mrb[8].mxu1  ;;  %v677_v60 = vpack.c.bf16 %v1323_v57, %v1319_v55 }
 0x1e1   : > { %v638_v61 = vadd.f32 %v1203_v59, %v1010_v38  ;;  %v629_v62 = vpop.f32.mrb[9].mxu1  ;;  %v676_v63 = vpack.c.bf16 %v1325_v58, %v1321_v56 }
 0x1e2   : > { %v630_v0 = vadd.f32 %v1010_v38, %v629_v62  ;;  %v1204_v1 = vpop.f32.mrb[10].mxu1 }
 0x1e3   : > { %1334 = vtanh.f32 %v638_v61  ;;  %v641_v2 = vadd.f32 %v1204_v1, %v1010_v38  ;;  %v632_v3 = vpop.f32.mrb[11].mxu1  ;;  %1225 = vmatprep.mubr.bf16.mxu0 %v676_v63 }
 0x1e4   : > { %1336 = vtanh.f32 %v630_v0  ;;  %v633_v4 = vadd.f32 %v1010_v38, %v632_v3  ;;  %1226 = vmatmul.mubr.bf16.vlgmr.msra.gmra.mrb[16].mxu0 %v677_v60 }
 0x1e5   : > { %v1327_v5 = vpop.eup %1326  ;;  %1338 = vtanh.f32 %v641_v2 }
 0x1e6   : > { %v1329_v6 = vpop.eup %1328  ;;  %1340 = vtanh.f32 %v633_v4 }
 0x1e7   : > { %v1331_v7 = vpop.eup %1330 }
 0x1e8   : > { %v1333_v8 = vpop.eup %1332  ;;  %v1207_v9 = vpop.f32.mrb[12].mxu1  ;;  %v679_v10 = vpack.c.bf16 %v1331_v7, %v1327_v5 }
 0x1e9   : > { %v654_v11 = vadd.f32 %v1207_v9, %v1010_v38  ;;  %v645_v12 = vpop.f32.mrb[13].mxu1  ;;  %v678_v13 = vpack.c.bf16 %v1333_v8, %v1329_v6 }
 0x1ea   : > { %v646_v14 = vadd.f32 %v1010_v38, %v645_v12  ;;  %v1208_v15 = vpop.f32.mrb[14].mxu1 }
 0x1eb   : > { %1342 = vtanh.f32 %v654_v11  ;;  %v657_v16 = vadd.f32 %v1208_v15, %v1010_v38  ;;  %v648_v17 = vpop.f32.mrb[15].mxu1  ;;  %1229 = vmatprep.mubr.bf16.mxu0 %v678_v13 }
 0x1ec   : > { %1344 = vtanh.f32 %v646_v14  ;;  %v649_v18 = vadd.f32 %v1010_v38, %v648_v17  ;;  %1230 = vmatmul.mubr.bf16.gmra.mrb[20].mxu0 %v679_v10 }
 0x1ed   : > { %v1335_v19 = vpop.eup %1334  ;;  %1346 = vtanh.f32 %v657_v16 }
 0x1ee   : > { %v1337_v20 = vpop.eup %1336  ;;  %1348 = vtanh.f32 %v649_v18 }
 0x1ef   : > { %v1339_v21 = vpop.eup %1338 }
 0x1f0   : > { %v1341_v22 = vpop.eup %1340  ;;  %v681_v23 = vpack.c.bf16 %v1339_v21, %v1335_v19 }
 0x1f1   : > { %v680_v24 = vpack.c.bf16 %v1341_v22, %v1337_v20 }
 0x1f3   : > { %1233 = vmatprep.mubr.bf16.mxu0 %v680_v24 }
 0x1f4   : > { %1234 = vmatmul.mubr.bf16.gmra.mrb[24].mxu0 %v681_v23 }
 0x1f5   : > { %v1343_v25 = vpop.eup %1342 }
 0x1f6   : > { %v1345_v26 = vpop.eup %1344 }
 0x1f7   : > { %v1347_v27 = vpop.eup %1346 }
 0x1f8   : > { %v1349_v28 = vpop.eup %1348  ;;  %v683_v29 = vpack.c.bf16 %v1347_v27, %v1343_v25 }
 0x1f9   : > { %v682_v30 = vpack.c.bf16 %v1349_v28, %v1345_v26 }
 0x1fb   : > { %1237 = vmatprep.mubr.bf16.mxu1 %v682_v30 }
 0x1fc   : > { %1238 = vmatmul.mubr.bf16.vlgmr.msra.gmra.mrb[16].mxu1 %v683_v29 }
 0x2b7   : > { %v1227_v31 = vpop.f32.mrb[16].mxu0 }
 0x2b8   : > { %v789_v33 = vpop.f32.mrb[17].mxu0  ;;  %v798_v35 = vadd.f32 %v1227_v31, %v1019_v32 }
 0x2b9   : > { %v1228_v34 = vpop.f32.mrb[18].mxu0  ;;  %v790_v38 = vadd.f32 %v1019_v32, %v789_v33 }
 0x2ba   : > { %v801_v36 = vadd.f32 %v1228_v34, %v1019_v32  ;;  %v792_v37 = vpop.f32.mrb[19].mxu0 }
 0x2bb   : > { %v793_v39 = vadd.f32 %v1019_v32, %v792_v37 }
 0x2bc   : > { %v1070_v40 = vpack.c.bf16 %v801_v36, %v798_v35 }
 0x2bd   : > { %v1065_v41 = vpack.c.bf16 %v793_v39, %v790_v38 }
 0x2be   : > { %1102 = vst [vmem:[%s1541_s15 + $0x8] sm:$0xff] %v1070_v40  }
 0x2bf   : > { %1066 = vst [vmem:[%s1541_s15] sm:$0xff] %v1065_v41   ;;  %v1231_v42 = vpop.f32.mrb[20].mxu0 }
 0x2c0   : > { %v805_v43 = vpop.f32.mrb[21].mxu0  ;;  %v814_v45 = vadd.f32 %v1231_v42, %v1019_v32 }
 0x2c1   : > { %v1232_v44 = vpop.f32.mrb[22].mxu0  ;;  %v806_v48 = vadd.f32 %v1019_v32, %v805_v43 }
 0x2c2   : > { %v817_v46 = vadd.f32 %v1232_v44, %v1019_v32  ;;  %v808_v47 = vpop.f32.mrb[23].mxu0 }
 0x2c3   : > { %v809_v49 = vadd.f32 %v1019_v32, %v808_v47 }
 0x2c4   : > { %v1080_v50 = vpack.c.bf16 %v817_v46, %v814_v45 }
 0x2c5   : > { %v1075_v51 = vpack.c.bf16 %v809_v49, %v806_v48 }
 0x2c6   : > { %1104 = vst [vmem:[%s1541_s15 + $0x18] sm:$0xff] %v1080_v50  }
 0x2c7   : > { %1103 = vst [vmem:[%s1541_s15 + $0x10] sm:$0xff] %v1075_v51   ;;  %v1235_v52 = vpop.f32.mrb[24].mxu0 }
 0x2c8   : > { %v821_v53 = vpop.f32.mrb[25].mxu0  ;;  %v830_v55 = vadd.f32 %v1235_v52, %v1019_v32 }
 0x2c9   : > { %v1236_v54 = vpop.f32.mrb[26].mxu0  ;;  %v822_v58 = vadd.f32 %v1019_v32, %v821_v53 }
 0x2ca   : > { %v833_v56 = vadd.f32 %v1236_v54, %v1019_v32  ;;  %v824_v57 = vpop.f32.mrb[27].mxu0 }
 0x2cb   : > { %v825_v59 = vadd.f32 %v1019_v32, %v824_v57 }
 0x2cc   : > { %v1090_v60 = vpack.c.bf16 %v833_v56, %v830_v55 }
 0x2cd   : > { %v1085_v61 = vpack.c.bf16 %v825_v59, %v822_v58 }
 0x2ce   : > { %1106 = vst [vmem:[%s1541_s15 + $0x28] sm:$0xff] %v1090_v60  }
 0x2cf   : > { %1105 = vst [vmem:[%s1541_s15 + $0x20] sm:$0xff] %v1085_v61   ;;  %v1239_v62 = vpop.f32.mrb[16].mxu1 }
 0x2d0   : > { %v837_v63 = vpop.f32.mrb[17].mxu1  ;;  %v846_v1 = vadd.f32 %v1239_v62, %v1019_v32 }
 0x2d1   : > { %v1240_v0 = vpop.f32.mrb[18].mxu1  ;;  %v838_v4 = vadd.f32 %v1019_v32, %v837_v63 }
 0x2d2   : > { %v849_v2 = vadd.f32 %v1240_v0, %v1019_v32  ;;  %v840_v3 = vpop.f32.mrb[19].mxu1 }
 0x2d3   : > { %v841_v5 = vadd.f32 %v1019_v32, %v840_v3 }
 0x2d4   : > { %v1100_v6 = vpack.c.bf16 %v849_v2, %v846_v1 }
 0x2d5   : > { %v1095_v7 = vpack.c.bf16 %v841_v5, %v838_v4 }
 0x2d6   : > { %1108 = vst [vmem:[%s1541_s15 + $0x38] sm:$0xff] %v1100_v6  }
 0x2d7   : > { %1107 = vst [vmem:[%s1541_s15 + $0x30] sm:$0xff] %v1095_v7  }
 0x2d8 PF: > { %s17_s24 = sadd.s32 1, %s1356_s24  }
 0x2d9   : > { %p14_p4 = scmp.ge.s32.totalorder %s17_s24, 4  }
 0x2db   :  { %16 = sbr.rel (!%p14_p4) target bundleno = 1 (0x1), region = 78 }

</bundles_post_ra>
